<compile_context>
chip_gen: v7x
topology: tpu7x:2x2x1
jax: 0.10.0
libtpu: 0.0.40
codegen_flags: <defaults>
</compile_context>

<pallas_src>
import jax
import jax.numpy as jnp
from jax.experimental import pallas as pl
from jax.experimental.pallas import tpu as pltpu


def _round_up(x, m):
    return (x + m - 1) // m * m


# ---------------------------------------------------------------------------
# One-time fusion kernel: L = emb @ W.T + b   ->  bf16 (Vr, Vpad)
# ---------------------------------------------------------------------------
def _fused_table_kernel(emb_ref, wt_ref, b_ref, l_ref):
    """emb_ref f32[TV,E]; wt_ref f32[E,Vpad]; b_ref f32[1,Vpad]; l_ref bf16[TV,Vpad]."""
    acc = jnp.dot(emb_ref[...], wt_ref[...], preferred_element_type=jnp.float32)
    l_ref[...] = (acc + b_ref[...]).astype(l_ref.dtype)


@jax.jit
def precompute_logits_table(emb_table, w_t, bias):
    """emb_table (V,E) f32, w_t (E,V) f32, bias (V,) f32 -> bf16 table (Vr, Vpad).

    Columns V..Vpad are baked to -inf so the padded, lane-dense logits can be
    consumed directly by softmax/argmax without slicing.
    """
    V, E = emb_table.shape
    Vpad = _round_up(V, 128)            # lane-dense output columns
    TV = min(512, _round_up(V, 8))      # row tile of the one-time matmul
    Vr = _round_up(V, TV)               # padded row count (divisible by TV)

    emb_pad = jnp.zeros((Vr, E), emb_table.dtype).at[:V].set(emb_table)
    wt_pad = jnp.zeros((E, Vpad), w_t.dtype).at[:, :V].set(w_t)
    b_pad = jnp.full((1, Vpad), -jnp.inf, jnp.float32).at[:, :V].set(
        bias.reshape(1, V).astype(jnp.float32)
    )

    # TODO(synk): for very large E, add a K grid axis + f32 VMEM accumulator
    # (this one-time matmul is tiny for bigram-model configs).
    return pl.pallas_call(
        _fused_table_kernel,
        out_shape=jax.ShapeDtypeStruct((Vr, Vpad), jnp.bfloat16),
        grid=(Vr // TV,),
        in_specs=[
            pl.BlockSpec((TV, E), lambda i: (i, 0)),
            pl.BlockSpec((E, Vpad), lambda i: (0, 0)),
            pl.BlockSpec((1, Vpad), lambda i: (0, 0)),
        ],
        out_specs=pl.BlockSpec((TV, Vpad), lambda i: (i, 0)),
        compiler_params=pltpu.CompilerParams(
            dimension_semantics=("parallel",),
        ),
    )(emb_pad, wt_pad, b_pad)


# ---------------------------------------------------------------------------
# Per-call forward kernel: scalar-prefetch driven row gather of the fused table
# ---------------------------------------------------------------------------
def _gather_row_kernel(tok_sref, row_ref, out_ref):
    """tok_sref i32[N] (SMEM prefetch); row_ref bf16[1,Vpad]; out_ref f32[1,Vpad]."""
    # Dropout is the identity in inference mode (model.eval()).
    # TODO(synk): training-mode dropout mask is not implemented.
    out_ref[...] = row_ref[...].astype(out_ref.dtype)


@jax.jit
def bigram_forward_padded(tokens, logits_table):
    """tokens (B, 2) int; logits_table (Vr, Vpad) bf16 -> (B*2, Vpad) f32.

    Lane-dense output; columns >= V hold -inf.
    NOTE: token ids must lie in [0, V) (PyTorch's nn.Embedding would also
    reject out-of-range ids); an out-of-range id would drive an OOB gather DMA.
    """
    _, Vpad = logits_table.shape
    N = tokens.shape[0] * tokens.shape[1]
    tok_flat = tokens.reshape(N).astype(jnp.int32)

    return pl.pallas_call(
        _gather_row_kernel,
        out_shape=jax.ShapeDtypeStruct((N, Vpad), jnp.float32),
        grid_spec=pltpu.PrefetchScalarGridSpec(
            num_scalar_prefetch=1,
            grid=(N,),
            in_specs=[
                # Data-dependent row gather: block row index = token id (SMEM).
                pl.BlockSpec((1, Vpad), lambda i, tok: (tok[i], 0)),
            ],
            out_specs=pl.BlockSpec((1, Vpad), lambda i, tok: (i, 0)),
        ),
        compiler_params=pltpu.CompilerParams(
            dimension_semantics=("parallel",),
        ),
    )(tok_flat, logits_table)


def bigram_forward(tokens, logits_table, vocab_size):
    """Module-shaped output (B*2, V) f32 (strips the lane padding).

    Prefer consuming `bigram_forward_padded` directly inside a jitted
    generate() step: the padded columns are -inf, so softmax/argmax are safe
    and the lane-sparse slice copy is avoided.
    """
    return bigram_forward_padded(tokens, logits_table)[:, :vocab_size]


if __name__ == "__main__":
    # Small config consistent with the module: vocab_size, embed_dim, dropout.
    VOCAB_SIZE = 64
    EMBED_DIM = 32
    BATCH = 2
    SEQ = 2  # bigram model: forward expects (batch_size, 2)

    key = jax.random.PRNGKey(0)
    k_emb, k_lin, k_tok = jax.random.split(key, 3)

    # Deterministic init mirroring _init_weights: N(0, 0.02) weights, zero bias.
    emb_table = 0.02 * jax.random.normal(k_emb, (VOCAB_SIZE, EMBED_DIM), jnp.float32)
    lin_weight = 0.02 * jax.random.normal(k_lin, (VOCAB_SIZE, EMBED_DIM), jnp.float32)
    lin_bias = jnp.zeros((VOCAB_SIZE,), jnp.float32)

    # One-time fusion (amortized across every generate() step).
    table = precompute_logits_table(emb_table, lin_weight.T, lin_bias)

    tokens = jax.random.randint(k_tok, (BATCH, SEQ), 0, VOCAB_SIZE, jnp.int32)

    logits_padded = jax.block_until_ready(bigram_forward_padded(tokens, table))
    logits = logits_padded[:, :VOCAB_SIZE]

    # Pure-JAX f32 reference of the same forward pass.
    x_emb = emb_table[tokens.reshape(-1)]          # (B*2, E)
    ref = x_emb @ lin_weight.T + lin_bias          # (B*2, V)

    assert logits.shape == (BATCH * SEQ, VOCAB_SIZE)
    # Table is stored in bf16 (f32 accumulate at precompute) -> loosened tolerance.
    assert jnp.allclose(logits, ref, atol=2e-3, rtol=2e-2), float(
        jnp.max(jnp.abs(logits - ref))
    )
    # Lane-padding columns must be -inf (safe for softmax/argmax on padded shape).
    if logits_padded.shape[1] > VOCAB_SIZE:
        assert bool(jnp.all(jnp.isneginf(logits_padded[:, VOCAB_SIZE:])))

    print("KERNEL_OK")
</pallas_src>

<mosaic_0001>
module attributes {stable_mosaic.version = 11 : i64} {
  func.func @_fused_table_kernel(%arg0: i32, %arg1: memref<64x32xf32, #tpu.memory_space<vmem>>, %arg2: memref<32x128xf32, #tpu.memory_space<vmem>>, %arg3: memref<1x128xf32, #tpu.memory_space<vmem>>, %arg4: memref<64x128xbf16, #tpu.memory_space<vmem>>) attributes {dimension_semantics = [#tpu.dimension_semantics<parallel>], iteration_bounds = array<i64: 1>, scalar_prefetch = 0 : i64, scratch_operands = 0 : i64, tpu.core_type = #tpu.core_type<tc>, window_params = [{transform_indices = @transform_0, window_bounds = array<i64: 64, 32>}, {pipeline_mode = #tpu.pipeline_mode<synchronous>, transform_indices = @transform_1, window_bounds = array<i64: 32, 128>}, {pipeline_mode = #tpu.pipeline_mode<synchronous>, transform_indices = @transform_2, window_bounds = array<i64: 1, 128>}, {transform_indices = @transform_3, window_bounds = array<i64: 64, 128>}]} {
    %c0 = arith.constant 0 : index
    %c0_0 = arith.constant 0 : index
    %0 = vector.load %arg1[%c0, %c0_0] : memref<64x32xf32, #tpu.memory_space<vmem>>, vector<64x32xf32>
    %c0_1 = arith.constant 0 : index
    %c0_2 = arith.constant 0 : index
    %1 = vector.load %arg2[%c0_1, %c0_2] : memref<32x128xf32, #tpu.memory_space<vmem>>, vector<32x128xf32>
    %cst = arith.constant dense<0.000000e+00> : vector<64x128xf32>
    %2 = tpu.matmul %0, %1, %cst {dimension_numbers = #tpu.dot_dimension_numbers<[1], [0], [0], [1], [0, 0, 1, 1], [], []>} : vector<64x32xf32>, vector<32x128xf32>, vector<64x128xf32> -> vector<64x128xf32>
    %c0_3 = arith.constant 0 : index
    %c0_4 = arith.constant 0 : index
    %3 = vector.load %arg3[%c0_3, %c0_4] : memref<1x128xf32, #tpu.memory_space<vmem>>, vector<1x128xf32>
    %4 = vector.broadcast %3 : vector<1x128xf32> to vector<64x128xf32>
    %5 = arith.addf %2, %4 : vector<64x128xf32>
    %6 = arith.truncf %5 : vector<64x128xf32> to vector<64x128xbf16>
    %c0_5 = arith.constant 0 : index
    %c0_6 = arith.constant 0 : index
    %7 = vector.load %arg4[%c0_5, %c0_6] : memref<64x128xbf16, #tpu.memory_space<vmem>>, vector<64x128xbf16>
    tpu.vector_store %arg4[%c0_5, %c0_6], %6 {strides = array<i32>} : memref<64x128xbf16, #tpu.memory_space<vmem>>, vector<64x128xbf16>,
    return
  }
  func.func @transform_0(%arg0: i32) -> (i32, i32) {
    %c0_i32 = arith.constant 0 : i32
    %c0_i32_0 = arith.constant 0 : i32
    return %arg0, %c0_i32 : i32, i32
  }
  func.func @transform_1(%arg0: i32) -> (i32, i32) {
    %c0_i32 = arith.constant 0 : i32
    %c0_i32_0 = arith.constant 0 : i32
    %c0_i32_1 = arith.constant 0 : i32
    return %c0_i32, %c0_i32_0 : i32, i32
  }
  func.func @transform_2(%arg0: i32) -> (i32, i32) {
    %c0_i32 = arith.constant 0 : i32
    %c0_i32_0 = arith.constant 0 : i32
    %c0_i32_1 = arith.constant 0 : i32
    return %c0_i32, %c0_i32_0 : i32, i32
  }
  func.func @transform_3(%arg0: i32) -> (i32, i32) {
    %c0_i32 = arith.constant 0 : i32
    %c0_i32_0 = arith.constant 0 : i32
    return %arg0, %c0_i32 : i32, i32
  }
}

</mosaic_0001>

<bundles_post_ra>
// kernel: precompute_logits_table.1
= control target key start
LH: loop header
LB: loop body
LE: loop exit
PB: predicated region body
PF: predicated region fallthrough
CT: control target
= control target key end

     0   :  { %vm34_vm0 = vcmask 261120   ;;  %s421_s0 = inlined_call_operand.vmem [shape: f32[64,32], index: 0, kind: input, shape index: {}]   ;;  %s422_s1 = inlined_call_operand.vmem [shape: f32[32,128], index: 1, kind: input, shape index: {}]   ;;  %s423_s2 = inlined_call_operand.vmem [shape: f32[1,128], index: 2, kind: input, shape index: {}]   ;;  %s424_s3 = inlined_call_operand.hbm [shape: bf16[64,128], index: 3, kind: output, shape index: {}]  }
   0x1   :  { %v23_v0 = vld [vmem:[%s422_s1] sm:$0xff]  ;;  %v24_v1 = vld [vmem:[%s422_s1 + $0x8] sm:$0xff]  ;;  %v25_v2 = vld [vmem:[%s422_s1 + $0x10] sm:$0xff] }
   0x2   :  { %v300_v3 = vpack.c.bf16 %v24_v1, %v23_v0  ;;  %v26_v4 = vld [vmem:[%s422_s1 + $0x18] sm:$0xff]  ;;  %v15_v5 = vld [vmem:[%s421_s0] sm:$0xff] }
   0x3   :  { %v19_v6 = vld [vmem:[%s421_s0 + $0x20] sm:$0xff]  ;;  %v304_v7 = vpack.c.bf16 %v26_v4, %v25_v2  ;;  %288 = vmatprep.mubr.msk.f32.mxu0 %vm34_vm0, %v15_v5 }
   0x4   :  { %294 = vmatprep.mubr.msk.f32.mxu1 %vm34_vm0, %v19_v6  ;;  %301 = vmatprep.subr.bf16.mxu0 %v300_v3 }
   0x5   :  { %308 = vmatprep.subr.bf16.mxu1 %v300_v3  ;;  %303 = vmatpush3.bf16.msra.mxu0 %v300_v3 }
   0x6   :  { %310 = vmatpush3.bf16.msra.mxu1 %v300_v3 }
   0x7   :  { %8 = vsyncpa [#allocation3], 0  ;;  %305 = vmatprep.subr.bf16.mxu0 %v304_v7  ;;  %309 = vmatprep.subr.bf16.mxu1 %v304_v7  ;;  %v16_v8 = vld [vmem:[%s421_s0 + $0x8] sm:$0xff]  ;;  %v17_v10 = vld [vmem:[%s421_s0 + $0x10] sm:$0xff] }
   0x8   :  { %v20_v9 = vld [vmem:[%s421_s0 + $0x28] sm:$0xff]  ;;  %v21_v11 = vld [vmem:[%s421_s0 + $0x30] sm:$0xff]  ;;  %v18_v12 = vld [vmem:[%s421_s0 + $0x18] sm:$0xff] }
   0x9   :  { %307 = vmatpush3.bf16.msra.mxu0 %v304_v7  ;;  %v22_v13 = vld [vmem:[%s421_s0 + $0x38] sm:$0xff]  ;;  %v220_v14 = vld [vmem:[%s423_s2] ss:$0 sm:$0xff]  ;;  %s339_s0 = smov [#allocation2]  }
   0xa   :  { %311 = vmatpush3.bf16.msra.mxu1 %v304_v7  ;;  %s209_s10 = sshll.u32 %s339_s0, 4  ;;  %s210_s10 = int_to_ptr.vmem [resolvable:$true] %s209_s10 }
   0xb   :  { %s315_s2 = scalar_lea.vmem %s210_s10, 512  ;;  %p320_p1 = scmp.lt.s32.totalorder %s210_s10, %s210_s10 }
   0xc   :  { %289 = vmatmul.mubr.msk.f32.vlgmr.msra.gmra.mrb[0].mxu0 %vm34_vm0, %v16_v8  ;;  %p316_p0 = scmp.ne.s32.totalorder %s210_s10, %s315_s2  ;;  %p321_p2 = scmp.lt.s32.totalorder %s315_s2, %s315_s2 }
   0xd   :  { %295 = vmatmul.mubr.msk.f32.vlgmr.msra.gmra.mrb[0].mxu1 %vm34_vm0, %v20_v9  ;;  %291 = vmatprep.mubr.msk.f32.mxu0 %vm34_vm0, %v17_v10 }
   0xe   :  { %297 = vmatprep.mubr.msk.f32.mxu1 %vm34_vm0, %v21_v11  ;;  %p322_p3 = por %p321_p2, %p320_p1 }
  0x10   :  { %292 = vmatmul.mubr.msk.f32.gmra.mrb[2].mxu0 %vm34_vm0, %v18_v12  ;;  %p323_p4 = pnand %p322_p3, %p316_p0 }
  0x11   :  { %298 = vmatmul.mubr.msk.f32.gmra.mrb[2].mxu1 %vm34_vm0, %v22_v13 }
  0xdf   :  { %v290_v15 = vpop.f32.mrb[0].mxu0 }
  0xe0   :  { %v296_v16 = vpop.f32.mrb[0].mxu1  ;;  %v131_v17 = vadd.f32 %v290_v15, %v220_v14  ;;  %v125_v19 = vpop.f32.mrb[1].mxu0 }
  0xe1   :  { %v151_v18 = vadd.f32 %v296_v16, %v220_v14  ;;  %v145_v20 = vpop.f32.mrb[1].mxu1  ;;  %v126_v21 = vadd.f32 %v220_v14, %v125_v19 }
  0xe2   :  { %v146_v22 = vadd.f32 %v220_v14, %v145_v20 }
  0xe3   :  { %v248_v23 = vpack.c.bf16 %v131_v17, %v126_v21  ;;  %v293_v25 = vpop.f32.mrb[2].mxu0 }
  0xe4   :  { %v258_v24 = vpack.c.bf16 %v151_v18, %v146_v22  ;;  %v299_v26 = vpop.f32.mrb[2].mxu1  ;;  %v141_v27 = vadd.f32 %v293_v25, %v220_v14  ;;  %v135_v29 = vpop.f32.mrb[3].mxu0 }
  0xe5   :  { %v161_v28 = vadd.f32 %v299_v26, %v220_v14  ;;  %v155_v30 = vpop.f32.mrb[3].mxu1  ;;  %249 = vst [vmem:[#allocation2] sm:$0xff] %v248_v23   ;;  %v136_v31 = vadd.f32 %v220_v14, %v135_v29 }
  0xe6   :  { %266 = vst [vmem:[#allocation2 + $0x10] sm:$0xff] %v258_v24   ;;  %v156_v32 = vadd.f32 %v220_v14, %v155_v30 }
  0xe7   :  { %v253_v33 = vpack.c.bf16 %v141_v27, %v136_v31 }
  0xe8   :  { %v263_v34 = vpack.c.bf16 %v161_v28, %v156_v32 }
  0xe9   :  { %265 = vst [vmem:[#allocation2 + $0x8] sm:$0xff] %v253_v33  }
  0xea   :  { %267 = vst [vmem:[#allocation2 + $0x18] sm:$0xff] %v263_v34  }
  0xeb   :  { %326 = shalt.err (!%p323_p4)
}
  0xec   :  { %s327_s13 = scalar_lea.hbm %s424_s3, 512 }
  0xed   :  { %p328_p5 = scmp.ne.s32.totalorder %s424_s3, %s327_s13  ;;  %p331_p6 = scmp.lt.u32.totalorder %s327_s13, %s424_s3 }
  0xef   :  { %p333_p7 = pnand %p331_p6, %p328_p5 }
  0xf1   :  { %336 = shalt.err (!%p333_p7)
}
  0xf2   :  { %s340_s18 = smov 64   ;;  %s341_s19 = smov 4  }
  0xf3   :  { %215 = dma.vmem_to_hbm [thread:$0]  %s210_s10, 512, %s424_s3, [#allocation3], %s340_s18, %s340_s18, %s341_s19  }
  0xf4   :  { %337 = dma.done.wait [#allocation3], 512  }
  0xf5   :  { %338 = vsyncadd [#allocation3], 4294966784 }
  0xf6   :  { %219 = vsyncpa [#allocation3], 1 }

</bundles_post_ra>
